<compile_context>
chip_gen: v6e
topology: v6e:2x2x1
jax: 0.10.0
libtpu: 0.0.40
codegen_flags: <defaults>
</compile_context>

<pallas_src>
import functools

import jax
import jax.numpy as jnp
import numpy as np
from jax import lax
from jax.experimental import pallas as pl
from jax.experimental.pallas import tpu as pltpu

LANE = 128
MAX_TILE_ROWS = 8192   # multiple of 16 (bf16-safe); 4 MiB f32 / input / buffer
SUB_ROWS = 512         # in-kernel slab size (keeps temporaries ~256 KiB)


def _mwl2_kernel(pred_ref, tgt_ref, out_ref, acc_ref, *,
                 kb, b, grid_n, steps_per_core, n_cores,
                 tile_rows, sub_rows, n_sub, acc_rows, last_valid_rows):
    c = pl.program_id(0)          # core / parallel axis
    j = pl.program_id(1)          # reduction steps per core
    blk = c * steps_per_core + j  # global row-block index

    ragged = last_valid_rows != tile_rows           # static
    padded = n_cores * steps_per_core > grid_n      # static
    n_full = grid_n - 1 if ragged else grid_n       # static

    @pl.when(j == 0)
    def _init():
        acc_ref[...] = jnp.zeros_like(acc_ref)

    def fold(x):
        # Fold rows into the vreg-shaped accumulator with pure VPU adds.
        if acc_rows == 8:
            return x.reshape(x.shape[0] // 8, 8, LANE).sum(axis=0)
        return x.sum(axis=0, keepdims=True)

    def contrib(p_raw, t_raw):
        p = p_raw.astype(jnp.float32)
        t = t_raw.astype(jnp.float32)
        # w = k*t + b*I, I = t +/- 1  =>  w = (k+b)*t + b*sign(t>=0)
        sign = jnp.where(t >= 0.0, 1.0, -1.0)
        w = kb * t + b * sign
        d = p - t
        return w * d * d

    def accumulate(masked):
        if n_sub == 1:
            ctr = contrib(pred_ref[...], tgt_ref[...])
            if masked:
                rows = lax.broadcasted_iota(jnp.int32, (tile_rows, LANE), 0)
                ctr = jnp.where(rows < last_valid_rows, ctr, 0.0)
            acc_ref[...] += fold(ctr)
        else:
            @pl.loop(0, n_sub)
            def _slab(s):
                r0 = pl.multiple_of(s * sub_rows, sub_rows)
                ctr = contrib(pred_ref[pl.ds(r0, sub_rows), :],
                              tgt_ref[pl.ds(r0, sub_rows), :])
                if masked:
                    rows = (lax.broadcasted_iota(jnp.int32, (sub_rows, LANE), 0)
                            + r0)
                    ctr = jnp.where(rows < last_valid_rows, ctr, 0.0)
                acc_ref[...] += fold(ctr)

    if not (ragged or padded):
        # Hot path (mask-free, gate-free): every block is full and in range.
        accumulate(masked=False)
    else:
        @pl.when(blk < n_full)
        def _full_blocks():
            accumulate(masked=False)

        if ragged:
            @pl.when(blk == grid_n - 1)
            def _last_block():
                accumulate(masked=True)
        # blocks with blk >= grid_n (core-padding) contribute nothing.

    @pl.when(j == pl.num_programs(1) - 1)
    def _finalize():
        # (1,128) per-core lane partial; wrapper does the last tiny reduce.
        out_ref[...] = jnp.sum(acc_ref[...], axis=0, keepdims=True)


def mwl2_loss(pred, target, k, b):
    assert pred.shape == target.shape
    total = int(np.prod(pred.shape))
    assert total > 0

    kb = float(k) + float(b)
    b_f = float(b)

    pred_f = pred.reshape(-1)   # free reshape, native dtype
    tgt_f = target.reshape(-1)

    rem = total % LANE
    main = total - rem

    # Ragged <128-element tail: plain jnp (negligible work, no pad/concat copy).
    if rem:
        tp = pred_f[main:].astype(jnp.float32)
        tt = tgt_f[main:].astype(jnp.float32)
        sign = jnp.where(tt >= 0.0, 1.0, -1.0)
        w = kb * tt + b_f * sign
        tail_sum = jnp.sum(w * (tp - tt) ** 2)
    else:
        tail_sum = jnp.float32(0.0)

    if main == 0:
        # Degenerate tiny input (< 128 elements): nothing for the kernel to do.
        return tail_sum / total

    n_rows = main // LANE
    # Common case (rem == 0): free reshape.  Rare ragged case: prefix slice
    # (may materialize a copy; only taken when total % 128 != 0).
    p2 = (pred_f[:main] if rem else pred_f).reshape(n_rows, LANE)
    t2 = (tgt_f[:main] if rem else tgt_f).reshape(n_rows, LANE)

    tile_rows = n_rows if n_rows <= MAX_TILE_ROWS else MAX_TILE_ROWS
    grid_n = pl.cdiv(n_rows, tile_rows)
    last_valid_rows = n_rows - (grid_n - 1) * tile_rows

    # 2-way split of the reduction for v7x's two TensorCores; on single-TC
    # v5e/v6e the parallel axis is just an outer loop (harmless).
    n_cores = 2 if grid_n >= 2 else 1
    steps_per_core = pl.cdiv(grid_n, n_cores)

    if tile_rows % 8 == 0:
        acc_rows = 8
        if tile_rows > SUB_ROWS and tile_rows % SUB_ROWS == 0:
            sub_rows = SUB_ROWS
        else:
            sub_rows = tile_rows
    else:
        acc_rows = 1
        sub_rows = tile_rows
    n_sub = tile_rows // sub_rows

    kernel = functools.partial(
        _mwl2_kernel,
        kb=kb, b=b_f,
        grid_n=grid_n, steps_per_core=steps_per_core, n_cores=n_cores,
        tile_rows=tile_rows, sub_rows=sub_rows, n_sub=n_sub,
        acc_rows=acc_rows, last_valid_rows=last_valid_rows,
    )

    def in_map(c, j):
        # Clamp core-padding steps onto the last real block (their result is
        # discarded in-kernel).
        return (jnp.minimum(c * steps_per_core + j, grid_n - 1), 0)

    out = pl.pallas_call(
        kernel,
        out_shape=jax.ShapeDtypeStruct((1, n_cores * LANE), jnp.float32),
        grid_spec=pltpu.PrefetchScalarGridSpec(
            num_scalar_prefetch=0,
            grid=(n_cores, steps_per_core),
            in_specs=[
                pl.BlockSpec((tile_rows, LANE), in_map),
                pl.BlockSpec((tile_rows, LANE), in_map),
            ],
            out_specs=pl.BlockSpec((1, LANE), lambda c, j: (0, c)),
            scratch_shapes=[pltpu.VMEM((acc_rows, LANE), jnp.float32)],
        ),
        compiler_params=pltpu.CompilerParams(
            dimension_semantics=("parallel", "arbitrary"),
            vmem_limit_bytes=48 << 20,   # 8192-row f32 tiles fit on every gen
        ),
    )(p2, t2)

    return (jnp.sum(out) + tail_sum) / total


def mwl2_reference(pred, target, k, b):
    t = target.astype(jnp.float32)
    p = pred.astype(jnp.float32)
    I = jnp.where(t >= 0.0, t + 1.0, t - 1.0)
    w = k * t + b * I
    return jnp.mean(w * (p - t) ** 2)


if __name__ == "__main__":
    # Module init args (deterministic, in-script): MWL2(k, b)
    K, B_COEF = 2.0, 0.5

    key = jax.random.PRNGKey(0)
    k1, k2, k3, k4 = jax.random.split(key, 4)

    # Primary (small, NCHW like the PyTorch usage): batch=2, channels=4, 16x16.
    pred = jax.random.normal(k1, (2, 4, 16, 16), dtype=jnp.float32)
    target = jax.random.normal(k2, (2, 4, 16, 16), dtype=jnp.float32)
    loss = jax.block_until_ready(mwl2_loss(pred, target, K, B_COEF))
    ref = jax.block_until_ready(mwl2_reference(pred, target, K, B_COEF))
    assert np.allclose(np.asarray(loss), np.asarray(ref),
                       rtol=1e-5, atol=1e-6), (loss, ref)

    # Secondary self-check exercising the multi-block / ragged / 2-core path.
    pred2 = jax.random.normal(k3, (1, 5, 641, 641), dtype=jnp.float32)
    target2 = jax.random.normal(k4, (1, 5, 641, 641), dtype=jnp.float32)
    loss2 = jax.block_until_ready(mwl2_loss(pred2, target2, K, B_COEF))
    ref2 = jax.block_until_ready(mwl2_reference(pred2, target2, K, B_COEF))
    assert np.allclose(np.asarray(loss2), np.asarray(ref2),
                       rtol=2e-4, atol=1e-6), (loss2, ref2)

    print("KERNEL_OK")
</pallas_src>

<mosaic_0001>
module attributes {stable_mosaic.version = 11 : i64} {
  func.func @_mwl2_kernel(%arg0: i32, %arg1: i32, %arg2: memref<16x128xf32, #tpu.memory_space<vmem>>, %arg3: memref<16x128xf32, #tpu.memory_space<vmem>>, %arg4: memref<1x128xf32, #tpu.memory_space<vmem>>, %arg5: memref<8x128xf32, #tpu.memory_space<vmem>>) attributes {dimension_semantics = [#tpu.dimension_semantics<parallel>, #tpu.dimension_semantics<arbitrary>], iteration_bounds = array<i64: 1, 1>, scalar_prefetch = 0 : i64, scratch_operands = 1 : i64, tpu.core_type = #tpu.core_type<tc>, window_params = [{transform_indices = @transform_0, window_bounds = array<i64: 16, 128>}, {transform_indices = @transform_1, window_bounds = array<i64: 16, 128>}, {transform_indices = @transform_2, window_bounds = array<i64: 1, 128>}]} {
    %c0_i32 = arith.constant 0 : i32
    %0 = arith.cmpi eq, %arg1, %c0_i32 : i32
    %1 = arith.extui %0 : i1 to i32
    %c0_i32_0 = arith.constant 0 : i32
    %2 = arith.cmpi ne, %1, %c0_i32_0 : i32
    scf.if %2 {
      %cst_15 = arith.constant 0.000000e+00 : f32
      %26 = vector.broadcast %cst_15 : f32 to vector<8x128xf32>
      %c0_16 = arith.constant 0 : index
      %c0_17 = arith.constant 0 : index
      %27 = vector.load %arg5[%c0_16, %c0_17] : memref<8x128xf32, #tpu.memory_space<vmem>>, vector<8x128xf32>
      tpu.vector_store %arg5[%c0_16, %c0_17], %26 {strides = array<i32>} : memref<8x128xf32, #tpu.memory_space<vmem>>, vector<8x128xf32>,
    } else {
    }
    %c0 = arith.constant 0 : index
    %c0_1 = arith.constant 0 : index
    %3 = vector.load %arg2[%c0, %c0_1] : memref<16x128xf32, #tpu.memory_space<vmem>>, vector<16x128xf32>
    %c0_2 = arith.constant 0 : index
    %c0_3 = arith.constant 0 : index
    %4 = vector.load %arg3[%c0_2, %c0_3] : memref<16x128xf32, #tpu.memory_space<vmem>>, vector<16x128xf32>
    %cst = arith.constant 0.000000e+00 : f32
    %5 = vector.broadcast %cst : f32 to vector<16x128xf32>
    %6 = arith.cmpf oge, %4, %5 : vector<16x128xf32>
    %cst_4 = arith.constant 1.000000e+00 : f32
    %cst_5 = arith.constant -1.000000e+00 : f32
    %7 = vector.broadcast %cst_4 : f32 to vector<16x128xf32>
    %8 = vector.broadcast %cst_5 : f32 to vector<16x128xf32>
    %9 = arith.select %6, %7, %8 : vector<16x128xi1>, vector<16x128xf32>
    %cst_6 = arith.constant 2.500000e+00 : f32
    %10 = vector.broadcast %cst_6 : f32 to vector<16x128xf32>
    %11 = arith.mulf %10, %4 : vector<16x128xf32>
    %cst_7 = arith.constant 5.000000e-01 : f32
    %12 = vector.broadcast %cst_7 : f32 to vector<16x128xf32>
    %13 = arith.mulf %12, %9 : vector<16x128xf32>
    %14 = arith.addf %11, %13 : vector<16x128xf32>
    %15 = arith.subf %3, %4 : vector<16x128xf32>
    %16 = arith.mulf %14, %15 : vector<16x128xf32>
    %17 = arith.mulf %16, %15 : vector<16x128xf32>
    %c0_8 = arith.constant 0 : index
    %c0_9 = arith.constant 0 : index
    %18 = vector.load %arg5[%c0_8, %c0_9] : memref<8x128xf32, #tpu.memory_space<vmem>>, vector<8x128xf32>
    %19 = vector.shape_cast %17 : vector<16x128xf32> to vector<2x8x128xf32>
    %cst_10 = arith.constant dense<0.000000e+00> : vector<8x128xf32>
    %20 = vector.multi_reduction <add>, %19, %cst_10 [0] : vector<2x8x128xf32> to vector<8x128xf32>
    %21 = arith.addf %18, %20 : vector<8x128xf32>
    %c0_11 = arith.constant 0 : index
    %c0_12 = arith.constant 0 : index
    %22 = vector.load %arg5[%c0_11, %c0_12] : memref<8x128xf32, #tpu.memory_space<vmem>>, vector<8x128xf32>
    tpu.vector_store %arg5[%c0_11, %c0_12], %21 {strides = array<i32>} : memref<8x128xf32, #tpu.memory_space<vmem>>, vector<8x128xf32>,
    %c0_i32_13 = arith.constant 0 : i32
    %23 = arith.cmpi eq, %arg1, %c0_i32_13 : i32
    %24 = arith.extui %23 : i1 to i32
    %c0_i32_14 = arith.constant 0 : i32
    %25 = arith.cmpi ne, %24, %c0_i32_14 : i32
    scf.if %25 {
      %c0_15 = arith.constant 0 : index
      %c0_16 = arith.constant 0 : index
      %26 = vector.load %arg5[%c0_15, %c0_16] : memref<8x128xf32, #tpu.memory_space<vmem>>, vector<8x128xf32>
      %cst_17 = arith.constant dense<0.000000e+00> : vector<128xf32>
      %27 = vector.multi_reduction <add>, %26, %cst_17 [0] : vector<8x128xf32> to vector<128xf32>
      %28 = vector.shape_cast %27 : vector<128xf32> to vector<1x128xf32>
      %c0_18 = arith.constant 0 : index
      %c0_19 = arith.constant 0 : index
      %29 = vector.load %arg4[%c0_18, %c0_19] : memref<1x128xf32, #tpu.memory_space<vmem>>, vector<1x128xf32>
      tpu.vector_store %arg4[%c0_18, %c0_19], %28 {strides = array<i32>} : memref<1x128xf32, #tpu.memory_space<vmem>>, vector<1x128xf32>,
    } else {
    }
    return
  }
  func.func @transform_0(%arg0: i32, %arg1: i32) -> (i32, i32) {
    %c1_i32 = arith.constant 1 : i32
    %0 = arith.muli %arg0, %c1_i32 : i32
    %1 = arith.addi %0, %arg1 : i32
    %c0_i32 = arith.constant 0 : i32
    %2 = arith.minsi %1, %c0_i32 : i32
    %c0_i32_0 = arith.constant 0 : i32
    %c0_i32_1 = arith.constant 0 : i32
    return %2, %c0_i32_0 : i32, i32
  }
  func.func @transform_1(%arg0: i32, %arg1: i32) -> (i32, i32) {
    %c1_i32 = arith.constant 1 : i32
    %0 = arith.muli %arg0, %c1_i32 : i32
    %1 = arith.addi %0, %arg1 : i32
    %c0_i32 = arith.constant 0 : i32
    %2 = arith.minsi %1, %c0_i32 : i32
    %c0_i32_0 = arith.constant 0 : i32
    %c0_i32_1 = arith.constant 0 : i32
    return %2, %c0_i32_0 : i32, i32
  }
  func.func @transform_2(%arg0: i32, %arg1: i32) -> (i32, i32) {
    %c0_i32 = arith.constant 0 : i32
    %c0_i32_0 = arith.constant 0 : i32
    return %c0_i32, %arg0 : i32, i32
  }
}

</mosaic_0001>

<bundles_post_ra>
// kernel: tpu_custom_call.1
= control target key start
LH: loop header
LB: loop body
LE: loop exit
PB: predicated region body
PF: predicated region fallthrough
CT: control target
= control target key end

     0   :  { %7 = vsyncpa [#allocation4], 0  ;;  %s222_s0 = inlined_call_operand.hbm [shape: f32[16,128], index: 0, kind: input, shape index: {}]   ;;  %s223_s1 = inlined_call_operand.hbm [shape: f32[16,128], index: 1, kind: input, shape index: {}]   ;;  %s224_s2 = inlined_call_operand.hbm [shape: f32[1,128], index: 2, kind: output, shape index: {}]  }
   0x1   :  { %8 = vsyncpa [#allocation7], 0 }
   0x2   :  { %9 = vsyncpa [#allocation5], 0  ;;  %s192_s9 = smov [#allocation3]  }
   0x3   :  { %s21_s10 = sshll.u32 %s192_s9, 4  ;;  %s22_s10 = int_to_ptr.vmem [resolvable:$true] %s21_s10 }
   0x4   :  { %s134_s11 = scalar_lea.vmem %s22_s10, 256  ;;  %p139_p1 = scmp.lt.s32.totalorder %s22_s10, %s22_s10 }
   0x5   :  { %p135_p0 = scmp.ne.s32.totalorder %s22_s10, %s134_s11  ;;  %p140_p2 = scmp.lt.s32.totalorder %s134_s11, %s134_s11 }
   0x7   :  { %p141_p3 = por %p140_p2, %p139_p1 }
   0x9   :  { %p142_p4 = pnand %p141_p3, %p135_p0 }
   0xb   :  { %145 = shalt.err (!%p142_p4)
}
   0xc   :  { %s193_s12 = smov 128   ;;  %s194_s13 = smov 8  }
   0xd   :  { %27 = dma.hbm_to_vmem [thread:$0]  %s222_s0, 256, %s22_s10, [#allocation4], %s193_s12, %s193_s12, %s194_s13  }
   0xe   :  { %s195_s16 = smov [#allocation6]  }
   0xf   :  { %s39_s17 = sshll.u32 %s195_s16, 4  ;;  %s40_s17 = int_to_ptr.vmem [resolvable:$true] %s39_s17 }
  0x10   :  { %s154_s18 = scalar_lea.vmem %s40_s17, 256  ;;  %p159_p6 = scmp.lt.s32.totalorder %s40_s17, %s40_s17 }
  0x11   :  { %p155_p5 = scmp.ne.s32.totalorder %s40_s17, %s154_s18  ;;  %p160_p7 = scmp.lt.s32.totalorder %s154_s18, %s154_s18 }
  0x13   :  { %p161_p8 = por %p160_p7, %p159_p6 }
  0x15   :  { %p162_p9 = pnand %p161_p8, %p155_p5 }
  0x17   :  { %165 = shalt.err (!%p162_p9)
}
  0x18   :  { %45 = dma.hbm_to_vmem [thread:$0]  %s223_s1, 256, %s40_s17, [#allocation7], %s193_s12, %s193_s12, %s194_s13  }
  0x19   :  { %186 = dma.done.wait [#allocation4], 256  }
  0x1a   :  { %187 = vsyncadd [#allocation4], 4294967040 }
  0x1b   :  { %188 = dma.done.wait [#allocation7], 256  }
  0x1c   :  { %189 = vsyncadd [#allocation7], 4294967040  ;;  %v65_v0 = vld [vmem:[#allocation3] sm:$0xff]  ;;  %v67_v1 = vld [vmem:[#allocation6] sm:$0xff]  ;;  %v196_v5 = vmov -1.0   ;;  %s197_s0 = smov [#allocation8]  }
  0x1d   :  { %v66_v2 = vld [vmem:[#allocation3 + $0x8] sm:$0xff]  ;;  %v68_v3 = vld [vmem:[#allocation6 + $0x8] sm:$0xff]  ;;  %vm69_vm0 = vcmp.ge.f32.partialorder %v67_v1, 0.0  ;;  %v73_v4 = vmul.f32 2.5, %v67_v1  ;;  %v79_v10 = vsub.f32 %v65_v0, %v67_v1  ;;  %s106_s1 = sshll.u32 %s197_s0, 4  ;;  %s107_s1 = int_to_ptr.vmem [resolvable:$true] %s106_s1 }
  0x1e   :  { %vm70_vm1 = vcmp.ge.f32.partialorder %v68_v3, 0.0  ;;  %v71_v6 = vsel %vm69_vm0, 1.0, %v196_v5  ;;  %v74_v7 = vmul.f32 2.5, %v68_v3  ;;  %v80_v12 = vsub.f32 %v66_v2, %v68_v3  ;;  %s166_s21 = scalar_lea.vmem %s107_s1, 16  ;;  %s170_s22 = scalar_lea.vmem %s107_s1, 32 }
  0x1f   :  { %v72_v8 = vsel %vm70_vm1, 1.0, %v196_v5  ;;  %v75_v9 = vmul.f32 0.5, %v71_v6  ;;  %p167_p10 = scmp.ne.s32.totalorder %s107_s1, %s166_s21  ;;  %p171_p11 = scmp.lt.s32.totalorder %s107_s1, %s107_s1 }
  0x20   :  { %v76_v11 = vmul.f32 0.5, %v72_v8  ;;  %p172_p12 = scmp.lt.s32.totalorder %s170_s22, %s166_s21 }
  0x21   :  { %v77_v13 = vadd.f32 %v75_v9, %v73_v4 }
  0x22   :  { %v78_v14 = vadd.f32 %v76_v11, %v74_v7  ;;  %p173_p13 = por %p172_p12, %p171_p11 }
  0x23   :  { %v81_v15 = vmul.f32 %v79_v10, %v77_v13 }
  0x24   :  { %v82_v16 = vmul.f32 %v80_v12, %v78_v14  ;;  %p174_p0 = pnand %p173_p13, %p167_p10 }
  0x25   :  { %v83_v17 = vmul.f32 %v81_v15, %v79_v10 }
  0x26   :  { %v84_v18 = vmul.f32 %v82_v16, %v80_v12 }
  0x28   :  { %v86_v19 = vadd.f32 %v84_v18, %v83_v17 }
  0x2a   :  { %v93_v20 = vrot.slane %v86_v19, 4 }
  0x2c   :  { %v94_v21 = vadd.f32 %v93_v20, %v86_v19 }
  0x2e   :  { %v95_v22 = vrot.slane %v94_v21, 2 }
  0x30   :  { %v96_v23 = vadd.f32 %v95_v22, %v94_v21 }
  0x32   :  { %v97_v24 = vrot.slane %v96_v23, 1 }
  0x34   :  { %v98_v25 = vadd.f32 %v97_v24, %v96_v23 }
  0x36   :  { %99 = vst [vmem:[#allocation8] sm:$0x1] %v98_v25 }
  0x37   :  { %177 = shalt.err (!%p174_p0)
}
  0x38   :  { %109 = dma.vmem_to_hbm [thread:$0]  %s107_s1, 16, %s224_s2, [#allocation5]  }
  0x39   :  { %190 = dma.done.wait [#allocation5], 16  }
  0x3a   :  { %191 = vsyncadd [#allocation5], 4294967280 }
  0x3b   :  { %113 = vsyncpa [#allocation4], 1 }
  0x3c   :  { %114 = vsyncpa [#allocation7], 1 }
  0x3d   :  { %115 = vsyncpa [#allocation5], 1 }

</bundles_post_ra>
